<compile_context>
chip_gen: v6e
topology: v6e:2x2x1
jax: 0.10.0
libtpu: 0.0.40
codegen_flags: <defaults>
</compile_context>

<pallas_src>
import jax
import jax.numpy as jnp
from jax.experimental import pallas as pl
from jax.experimental.pallas import tpu as pltpu


IN_FEATURES = 3
OUT_FEATURES = 1
DEFAULT_TM = 2048    # batch tile rows (multiple of 8)


def _linear_kernel(x_ref, w_ref, b_ref, o_ref):
    # x_ref: (TM, 3)  VMEM   raw input rows (no host-side padding)
    # w_ref: (1, 3)   VMEM   nn.Linear weight used directly (resident block)
    # b_ref: (1,)     SMEM   bias scalar
    # o_ref: (TM, 1)  VMEM   output tile, written directly (no lane padding)
    x = x_ref[...]                                   # (TM, 3) f32
    w = w_ref[...]                                   # (1, 3) -> sublane-broadcast over TM
    # K=3, N=1: one VPU multiply + one cross-lane (XLU) reduce beats the MXU here.
    y = jnp.sum(x * w, axis=-1, keepdims=True) + b_ref[0]      # (TM, 1) f32
    o_ref[...] = y.astype(o_ref.dtype)


def _round_up(v, m):
    return ((v + m - 1) // m) * m


def linear_forward(x, weight, bias, *, tm=DEFAULT_TM):
    """Forward of nn.Linear(3, 1): y = x @ W^T + b.

    x: (batch, 3), weight: (1, 3), bias: (1,)  ->  (batch, 1) float32
    """
    batch, k = x.shape
    assert k == IN_FEATURES
    assert weight.shape == (OUT_FEATURES, IN_FEATURES)
    assert bias.shape == (OUT_FEATURES,)

    x = x.astype(jnp.float32)
    w = weight.astype(jnp.float32)
    b = bias.astype(jnp.float32)

    # Batch tile: multiple of 8 sublanes, but no larger than needed for tiny batches.
    tm_eff = max(8, min(_round_up(tm, 8), _round_up(batch, 8)))
    grid = (pl.cdiv(batch, tm_eff),)

    out = pl.pallas_call(
        _linear_kernel,
        out_shape=jax.ShapeDtypeStruct((batch, OUT_FEATURES), jnp.float32),
        grid=grid,
        in_specs=[
            # x: tiled along batch; last dim (3) equals the full array dim.
            pl.BlockSpec((tm_eff, IN_FEATURES), lambda i: (i, 0)),
            # weight: full-extent (1, 3) block, same block index every step (stays resident).
            pl.BlockSpec((OUT_FEATURES, IN_FEATURES), lambda i: (0, 0)),
            # bias: scalar in SMEM.
            pl.BlockSpec(memory_space=pltpu.MemorySpace.SMEM),
        ],
        # output: last dim (1) equals the full array dim -> direct (batch, 1) write.
        out_specs=pl.BlockSpec((tm_eff, OUT_FEATURES), lambda i: (i, 0)),
        compiler_params=pltpu.CompilerParams(
            dimension_semantics=("parallel",)),  # shard batch tiles across TCs (v7x megacore)
    )(x, w, b)

    return out


if __name__ == "__main__":
    key = jax.random.PRNGKey(0)
    k_x, k_w, k_b = jax.random.split(key, 3)

    # Deterministic parameter init (mimics nn.Linear's uniform(-1/sqrt(3), 1/sqrt(3)))
    bound = 1.0 / (IN_FEATURES ** 0.5)
    weight = jax.random.uniform(k_w, (OUT_FEATURES, IN_FEATURES),
                                jnp.float32, -bound, bound)
    bias = jax.random.uniform(k_b, (OUT_FEATURES,), jnp.float32, -bound, bound)

    # Small example batch, consistent with the module: (batch, 3)
    batch = 4
    x = jax.random.normal(k_x, (batch, IN_FEATURES), jnp.float32)

    y = linear_forward(x, weight, bias)
    jax.block_until_ready(y)

    y_ref = x @ weight.T + bias
    assert y.shape == (batch, OUT_FEATURES)
    assert jnp.allclose(y, y_ref, atol=1e-5, rtol=1e-5)

    # Exercise the multi-tile / partial-tile path (batch not a multiple of the tile).
    big_batch = 1037
    xb = jax.random.normal(k_x, (big_batch, IN_FEATURES), jnp.float32)
    yb = linear_forward(xb, weight, bias, tm=256)   # grid of 5 tiles, last one partial
    jax.block_until_ready(yb)
    yb_ref = xb @ weight.T + bias
    assert yb.shape == (big_batch, OUT_FEATURES)
    assert jnp.allclose(yb, yb_ref, atol=1e-5, rtol=1e-5)

    print("KERNEL_OK")
</pallas_src>

<mosaic_0001>
module attributes {stable_mosaic.version = 11 : i64} {
  func.func @_linear_kernel(%arg0: i32, %arg1: memref<8x3xf32, #tpu.memory_space<vmem>>, %arg2: memref<1x3xf32, #tpu.memory_space<vmem>>, %arg3: memref<1xf32, #tpu.memory_space<smem>>, %arg4: memref<8x1xf32, #tpu.memory_space<vmem>>) attributes {dimension_semantics = [#tpu.dimension_semantics<parallel>], iteration_bounds = array<i64: 1>, scalar_prefetch = 0 : i64, scratch_operands = 0 : i64, tpu.core_type = #tpu.core_type<tc>, window_params = [{transform_indices = @transform_0, window_bounds = array<i64: 8, 3>}, {pipeline_mode = #tpu.pipeline_mode<synchronous>, transform_indices = @transform_1, window_bounds = array<i64: 1, 3>}, {transform_indices = @transform_2, window_bounds = array<i64: 1>}, {transform_indices = @transform_3, window_bounds = array<i64: 8, 1>}]} {
    %c0 = arith.constant 0 : index
    %c0_0 = arith.constant 0 : index
    %0 = vector.load %arg1[%c0, %c0_0] : memref<8x3xf32, #tpu.memory_space<vmem>>, vector<8x3xf32>
    %c0_1 = arith.constant 0 : index
    %c0_2 = arith.constant 0 : index
    %1 = vector.load %arg2[%c0_1, %c0_2] : memref<1x3xf32, #tpu.memory_space<vmem>>, vector<1x3xf32>
    %2 = vector.broadcast %1 : vector<1x3xf32> to vector<8x3xf32>
    %3 = arith.mulf %0, %2 : vector<8x3xf32>
    %cst = arith.constant dense<0.000000e+00> : vector<8xf32>
    %4 = vector.multi_reduction <add>, %3, %cst [1] : vector<8x3xf32> to vector<8xf32>
    %5 = vector.shape_cast %4 : vector<8xf32> to vector<8x1xf32>
    %c0_3 = arith.constant 0 : index
    %6 = memref.load %arg3[%c0_3] : memref<1xf32, #tpu.memory_space<smem>>
    %7 = vector.broadcast %6 : f32 to vector<8x1xf32>
    %8 = arith.addf %5, %7 : vector<8x1xf32>
    %c0_4 = arith.constant 0 : index
    %c0_5 = arith.constant 0 : index
    %9 = vector.load %arg4[%c0_4, %c0_5] : memref<8x1xf32, #tpu.memory_space<vmem>>, vector<8x1xf32>
    tpu.vector_store %arg4[%c0_4, %c0_5], %8 {strides = array<i32>} : memref<8x1xf32, #tpu.memory_space<vmem>>, vector<8x1xf32>,
    return
  }
  func.func @transform_0(%arg0: i32) -> (i32, i32) {
    %c0_i32 = arith.constant 0 : i32
    %c0_i32_0 = arith.constant 0 : i32
    return %arg0, %c0_i32 : i32, i32
  }
  func.func @transform_1(%arg0: i32) -> (i32, i32) {
    %c0_i32 = arith.constant 0 : i32
    %c0_i32_0 = arith.constant 0 : i32
    %c0_i32_1 = arith.constant 0 : i32
    return %c0_i32, %c0_i32_0 : i32, i32
  }
  func.func @transform_2(%arg0: i32) -> i32 {
    %c0_i32 = arith.constant 0 : i32
    %c0_i32_0 = arith.constant 0 : i32
    return %c0_i32 : i32
  }
  func.func @transform_3(%arg0: i32) -> (i32, i32) {
    %c0_i32 = arith.constant 0 : i32
    %c0_i32_0 = arith.constant 0 : i32
    return %arg0, %c0_i32 : i32, i32
  }
}

</mosaic_0001>

<bundles_post_ra>
// kernel: tpu_custom_call.1
= control target key start
LH: loop header
LB: loop body
LE: loop exit
PB: predicated region body
PF: predicated region fallthrough
CT: control target
= control target key end

     0   :  { %9 = vsyncpa [#allocation4], 0  ;;  %s150_s0 = inlined_call_operand.hbm [shape: f32[4,3], index: 0, kind: input, shape index: {}]   ;;  %s151_s1 = inlined_call_operand.vmem [shape: f32[1,3], index: 1, kind: input, shape index: {}]   ;;  %s152_s2 = inlined_call_operand.<no memory space> [shape: f32[1], index: 2, kind: input, shape index: {}]   ;;  %s153_s3 = inlined_call_operand.vmem [shape: f32[4,1], index: 3, kind: output, shape index: {}]  }
   0x1   :  { %14 = vsyncadd [#allocation4], 64  ;;  %s115_s12 = smov [#allocation3]  }
   0x2   :  { %s15_s13 = sshll.u32 %s115_s12, 4  ;;  %s16_s13 = int_to_ptr.vmem [resolvable:$true] %s15_s13 }
   0x3   :  { %s101_s14 = scalar_lea.vmem %s16_s13, 64  ;;  %s105_s15 = scalar_lea.vmem %s16_s13, 128 }
   0x4   :  { %p102_p0 = scmp.ne.s32.totalorder %s16_s13, %s101_s14  ;;  %p106_p1 = scmp.lt.s32.totalorder %s16_s13, %s16_s13 }
   0x5   :  { %p107_p2 = scmp.lt.s32.totalorder %s105_s15, %s101_s14 }
   0x7   :  { %p108_p3 = por %p107_p2, %p106_p1 }
   0x9   :  { %p109_p4 = pnand %p108_p3, %p102_p0 }
   0xb   :  { %112 = shalt.err (!%p109_p4)
}
   0xc   :  { %s116_s16 = smov 64   ;;  %s117_s17 = smov 4  }
   0xd   :  { %21 = dma.hbm_to_vmem [thread:$0]  %s150_s0, 64, %s16_s13, [#allocation4], %s116_s16, %s116_s16, %s117_s17  }
   0xe   :  { %113 = dma.done.wait [#allocation4], 128  }
   0xf   :  { %114 = vsyncadd [#allocation4], 4294967168  ;;  %v29_v0 = vld [vmem:[#allocation3] sm:$0xff]  ;;  %vm38_vm0 = vcmask 23552   ;;  %v43_v4 = vstv %s152_s2  ;;  %vm45_vm1 = vcmask 7168  }
  0x10   :  { %v89_v1 = vld [vmem:[%s151_s1] ss:$0 sm:$0xff] }
  0x11   :  { %v37_v2 = vmul.f32 %v89_v1, %v29_v0 }
  0x13   :  { %v39_v3 = vsel %vm38_vm0, %v37_v2, 0.0 }
  0x14   :  { %40 = vadd.xlane.f32.xlu0 %v39_v3 }
  0x9d   :  { %v41_v5 = vpop.xlane.xlu0 %40 }
  0x9e   :  { %v44_v6 = vadd.f32 %v43_v4, %v41_v5 }
  0xa0   :  { %46 = vst.msk [vmem:[#allocation5] sm:$0xff] %vm45_vm1, %v44_v6 }
  0xa7   :  { %v65_v7 = vld [vmem:[#allocation5] sm:$0xf] }
  0xa8   :  { %66 = vst [vmem:[%s153_s3] sm:$0xf] %v65_v7 }
  0xa9   :  { %84 = vsyncpa [#allocation4], 1 }

</bundles_post_ra>
